<compile_context>
chip_gen: v7x
topology: tpu7x:2x2x1
jax: 0.10.0
libtpu: 0.0.40
codegen_flags: <defaults>
</compile_context>

<pallas_src>
import functools

import jax
import jax.numpy as jnp
from jax.experimental import pallas as pl
from jax.experimental.pallas import tpu as pltpu

LANE = 128
DEFAULT_BLOCK_ROWS = 2048   # (2048,128) f32 = 1 MiB/block; 2 in x 2 bufs + 3 acc ~ 7 MiB VMEM (safe on v5e)
DEFAULT_NUM_CHUNKS = 2      # leading "parallel" axis -> both TensorCores on v7x; near-free elsewhere


def _round_up(x, m):
    return ((x + m - 1) // m) * m


def _f1_sums_kernel(p_ref, t_ref, out_ref, acc_pt, acc_p, acc_t,
                    *, rows, block_rows, blocks_per_chunk, needs_mask):
    c = pl.program_id(0)   # chunk (parallel across cores on megacore chips)
    i = pl.program_id(1)   # block within chunk (serial reduction axis)

    @pl.when(i == 0)
    def _():
        acc_pt[...] = jnp.zeros_like(acc_pt)
        acc_p[...] = jnp.zeros_like(acc_p)
        acc_t[...] = jnp.zeros_like(acc_t)

    # Cast in-kernel: inputs stream through HBM in their native dtype.
    p = p_ref[...].astype(jnp.float32)
    t = t_ref[...].astype(jnp.float32)

    if needs_mask:
        # Trailing / overrunning blocks: zero out rows past the real extent so
        # they contribute nothing (avoids any wrapper-side full padding pass).
        row0 = (c * blocks_per_chunk + i) * block_rows
        row_ids = row0 + jax.lax.broadcasted_iota(jnp.int32, (block_rows, LANE), 0)
        valid = row_ids < rows
        p = jnp.where(valid, p, 0.0)
        t = jnp.where(valid, t, 0.0)

    # Pure-VALU accumulation; fp/fn are derived from the sums at the end.
    acc_pt[...] += p * t
    acc_p[...] += p
    acc_t[...] += t

    @pl.when(i == pl.num_programs(1) - 1)
    def _():
        tp = jnp.sum(acc_pt[...])     # true positives
        sp = jnp.sum(acc_p[...])      # sum(predictions)
        st = jnp.sum(acc_t[...])      # sum(targets)
        col = jax.lax.broadcasted_iota(jnp.int32, (8, LANE), 1)
        out_ref[...] = jnp.where(
            col == 0, tp, jnp.where(col == 1, sp, jnp.where(col == 2, st, 0.0)))


def f1_score(predictions, targets, smooth=1.0,
             block_rows=DEFAULT_BLOCK_ROWS, num_chunks=DEFAULT_NUM_CHUNKS):
    """Pallas TPU implementation of F1Score.forward (returns scalar f32)."""
    p = jnp.reshape(predictions, (-1,))
    t = jnp.reshape(targets, (-1,))
    # Keep float inputs (f32/bf16/...) in their native dtype (fewer HBM bytes);
    # only promote non-float (bool/int) inputs for a clean TPU layout.
    if not jnp.issubdtype(p.dtype, jnp.floating):
        p = p.astype(jnp.float32)
    if not jnp.issubdtype(t.dtype, jnp.floating):
        t = t.astype(jnp.float32)

    n = p.shape[0]
    # Only pad (with zeros, which contribute 0 to all sums) up to the lane
    # width so the flat vector can be viewed as (rows, 128).  No block-sized pad.
    rem = n % LANE
    if rem:
        p = jnp.pad(p, (0, LANE - rem))
        t = jnp.pad(t, (0, LANE - rem))
    rows = p.shape[0] // LANE
    p2 = p.reshape(rows, LANE)
    t2 = t.reshape(rows, LANE)

    br = min(block_rows, _round_up(rows, 8))       # big block, but never bigger than needed
    total_blocks = pl.cdiv(rows, br)
    nc = max(1, min(num_chunks, total_blocks))     # chunks (parallel grid axis)
    bp = pl.cdiv(total_blocks, nc)                 # blocks per chunk (serial axis)
    needs_mask = nc * bp * br > rows

    def in_map(c, i):
        # Clamp so a fully masked-out trailing block never indexes past the array.
        return (jnp.minimum(c * bp + i, total_blocks - 1), 0)

    kernel = functools.partial(
        _f1_sums_kernel, rows=rows, block_rows=br,
        blocks_per_chunk=bp, needs_mask=needs_mask)

    partials = pl.pallas_call(
        kernel,
        out_shape=jax.ShapeDtypeStruct((nc, 8, LANE), jnp.float32),
        grid_spec=pltpu.PrefetchScalarGridSpec(
            num_scalar_prefetch=0,
            grid=(nc, bp),
            in_specs=[
                pl.BlockSpec((br, LANE), in_map),
                pl.BlockSpec((br, LANE), in_map),
            ],
            out_specs=pl.BlockSpec((None, 8, LANE), lambda c, i: (c, 0, 0)),
            scratch_shapes=[
                pltpu.VMEM((br, LANE), jnp.float32),   # sum(p * t)
                pltpu.VMEM((br, LANE), jnp.float32),   # sum(p)
                pltpu.VMEM((br, LANE), jnp.float32),   # sum(t)
            ],
        ),
        compiler_params=pltpu.CompilerParams(
            dimension_semantics=("parallel", "arbitrary")),
    )(p2, t2)

    tp = jnp.sum(partials[:, 0, 0])
    sum_p = jnp.sum(partials[:, 0, 1])
    sum_t = jnp.sum(partials[:, 0, 2])
    fp = sum_p - tp
    fn = sum_t - tp
    smooth = jnp.float32(smooth)
    precision = tp / (tp + fp + smooth)
    recall = tp / (tp + fn + smooth)
    return 2.0 * precision * recall / (precision + recall + smooth)


def _f1_ref(predictions, targets, smooth=1.0):
    p = jnp.reshape(predictions, (-1,)).astype(jnp.float32)
    t = jnp.reshape(targets, (-1,)).astype(jnp.float32)
    tp = jnp.sum(p * t)
    fp = jnp.sum((1.0 - t) * p)
    fn = jnp.sum(t * (1.0 - p))
    precision = tp / (tp + fp + smooth)
    recall = tp / (tp + fn + smooth)
    return 2.0 * precision * recall / (precision + recall + smooth)


if __name__ == "__main__":
    key = jax.random.PRNGKey(0)
    kp, kt = jax.random.split(key)
    # NCHW-style segmentation outputs: batch=2, channels=4, spatial=16x16
    preds = jax.random.uniform(kp, (2, 4, 16, 16), dtype=jnp.float32)
    targs = (jax.random.uniform(kt, (2, 4, 16, 16)) > 0.5).astype(jnp.float32)

    f1 = f1_score(preds, targs, smooth=1.0)
    jax.block_until_ready(f1)

    ref = _f1_ref(preds, targs, smooth=1.0)
    assert jnp.allclose(f1, ref, rtol=1e-5, atol=1e-5), (f1, ref)
    print("KERNEL_OK")
</pallas_src>

<mosaic_0001>
module attributes {stable_mosaic.version = 11 : i64} {
  func.func @_f1_sums_kernel(%arg0: i32, %arg1: i32, %arg2: memref<16x128xf32, #tpu.memory_space<vmem>>, %arg3: memref<16x128xf32, #tpu.memory_space<vmem>>, %arg4: memref<1x8x128xf32, #tpu.memory_space<vmem>>, %arg5: memref<16x128xf32, #tpu.memory_space<vmem>>, %arg6: memref<16x128xf32, #tpu.memory_space<vmem>>, %arg7: memref<16x128xf32, #tpu.memory_space<vmem>>) attributes {dimension_semantics = [#tpu.dimension_semantics<parallel>, #tpu.dimension_semantics<arbitrary>], iteration_bounds = array<i64: 1, 1>, scalar_prefetch = 0 : i64, scratch_operands = 3 : i64, tpu.core_type = #tpu.core_type<tc>, window_params = [{transform_indices = @transform_0, window_bounds = array<i64: 16, 128>}, {transform_indices = @transform_1, window_bounds = array<i64: 16, 128>}, {transform_indices = @transform_2, window_bounds = array<i64: 1, 8, 128>}]} {
    %c0_i32 = arith.constant 0 : i32
    %0 = arith.cmpi eq, %arg1, %c0_i32 : i32
    %1 = arith.extui %0 : i1 to i32
    %c0_i32_0 = arith.constant 0 : i32
    %2 = arith.cmpi ne, %1, %c0_i32_0 : i32
    scf.if %2 {
      %cst = arith.constant 0.000000e+00 : f32
      %18 = vector.broadcast %cst : f32 to vector<16x128xf32>
      %c0_18 = arith.constant 0 : index
      %c0_19 = arith.constant 0 : index
      %19 = vector.load %arg5[%c0_18, %c0_19] : memref<16x128xf32, #tpu.memory_space<vmem>>, vector<16x128xf32>
      tpu.vector_store %arg5[%c0_18, %c0_19], %18 {strides = array<i32>} : memref<16x128xf32, #tpu.memory_space<vmem>>, vector<16x128xf32>,
      %cst_20 = arith.constant 0.000000e+00 : f32
      %20 = vector.broadcast %cst_20 : f32 to vector<16x128xf32>
      %c0_21 = arith.constant 0 : index
      %c0_22 = arith.constant 0 : index
      %21 = vector.load %arg6[%c0_21, %c0_22] : memref<16x128xf32, #tpu.memory_space<vmem>>, vector<16x128xf32>
      tpu.vector_store %arg6[%c0_21, %c0_22], %20 {strides = array<i32>} : memref<16x128xf32, #tpu.memory_space<vmem>>, vector<16x128xf32>,
      %cst_23 = arith.constant 0.000000e+00 : f32
      %22 = vector.broadcast %cst_23 : f32 to vector<16x128xf32>
      %c0_24 = arith.constant 0 : index
      %c0_25 = arith.constant 0 : index
      %23 = vector.load %arg7[%c0_24, %c0_25] : memref<16x128xf32, #tpu.memory_space<vmem>>, vector<16x128xf32>
      tpu.vector_store %arg7[%c0_24, %c0_25], %22 {strides = array<i32>} : memref<16x128xf32, #tpu.memory_space<vmem>>, vector<16x128xf32>,
    } else {
    }
    %c0 = arith.constant 0 : index
    %c0_1 = arith.constant 0 : index
    %3 = vector.load %arg2[%c0, %c0_1] : memref<16x128xf32, #tpu.memory_space<vmem>>, vector<16x128xf32>
    %c0_2 = arith.constant 0 : index
    %c0_3 = arith.constant 0 : index
    %4 = vector.load %arg3[%c0_2, %c0_3] : memref<16x128xf32, #tpu.memory_space<vmem>>, vector<16x128xf32>
    %c0_4 = arith.constant 0 : index
    %c0_5 = arith.constant 0 : index
    %5 = vector.load %arg5[%c0_4, %c0_5] : memref<16x128xf32, #tpu.memory_space<vmem>>, vector<16x128xf32>
    %6 = arith.mulf %3, %4 : vector<16x128xf32>
    %7 = arith.addf %5, %6 : vector<16x128xf32>
    %c0_6 = arith.constant 0 : index
    %c0_7 = arith.constant 0 : index
    %8 = vector.load %arg5[%c0_6, %c0_7] : memref<16x128xf32, #tpu.memory_space<vmem>>, vector<16x128xf32>
    tpu.vector_store %arg5[%c0_6, %c0_7], %7 {strides = array<i32>} : memref<16x128xf32, #tpu.memory_space<vmem>>, vector<16x128xf32>,
    %c0_8 = arith.constant 0 : index
    %c0_9 = arith.constant 0 : index
    %9 = vector.load %arg6[%c0_8, %c0_9] : memref<16x128xf32, #tpu.memory_space<vmem>>, vector<16x128xf32>
    %10 = arith.addf %9, %3 : vector<16x128xf32>
    %c0_10 = arith.constant 0 : index
    %c0_11 = arith.constant 0 : index
    %11 = vector.load %arg6[%c0_10, %c0_11] : memref<16x128xf32, #tpu.memory_space<vmem>>, vector<16x128xf32>
    tpu.vector_store %arg6[%c0_10, %c0_11], %10 {strides = array<i32>} : memref<16x128xf32, #tpu.memory_space<vmem>>, vector<16x128xf32>,
    %c0_12 = arith.constant 0 : index
    %c0_13 = arith.constant 0 : index
    %12 = vector.load %arg7[%c0_12, %c0_13] : memref<16x128xf32, #tpu.memory_space<vmem>>, vector<16x128xf32>
    %13 = arith.addf %12, %4 : vector<16x128xf32>
    %c0_14 = arith.constant 0 : index
    %c0_15 = arith.constant 0 : index
    %14 = vector.load %arg7[%c0_14, %c0_15] : memref<16x128xf32, #tpu.memory_space<vmem>>, vector<16x128xf32>
    tpu.vector_store %arg7[%c0_14, %c0_15], %13 {strides = array<i32>} : memref<16x128xf32, #tpu.memory_space<vmem>>, vector<16x128xf32>,
    %c0_i32_16 = arith.constant 0 : i32
    %15 = arith.cmpi eq, %arg1, %c0_i32_16 : i32
    %16 = arith.extui %15 : i1 to i32
    %c0_i32_17 = arith.constant 0 : i32
    %17 = arith.cmpi ne, %16, %c0_i32_17 : i32
    scf.if %17 {
      %c0_18 = arith.constant 0 : index
      %c0_19 = arith.constant 0 : index
      %18 = vector.load %arg5[%c0_18, %c0_19] : memref<16x128xf32, #tpu.memory_space<vmem>>, vector<16x128xf32>
      %19 = vector.shape_cast %18 : vector<16x128xf32> to vector<1x16x128xf32>
      %cst = arith.constant dense<0.000000e+00> : vector<1xf32>
      %20 = vector.multi_reduction <add>, %19, %cst [1, 2] : vector<1x16x128xf32> to vector<1xf32>
      %21 = vector.shape_cast %20 : vector<1xf32> to vector<1x1x1xf32>
      %22 = vector.extract %21[0, 0, 0] : f32 from vector<1x1x1xf32>
      %c0_20 = arith.constant 0 : index
      %c0_21 = arith.constant 0 : index
      %23 = vector.load %arg6[%c0_20, %c0_21] : memref<16x128xf32, #tpu.memory_space<vmem>>, vector<16x128xf32>
      %24 = vector.shape_cast %23 : vector<16x128xf32> to vector<1x16x128xf32>
      %cst_22 = arith.constant dense<0.000000e+00> : vector<1xf32>
      %25 = vector.multi_reduction <add>, %24, %cst_22 [1, 2] : vector<1x16x128xf32> to vector<1xf32>
      %26 = vector.shape_cast %25 : vector<1xf32> to vector<1x1x1xf32>
      %27 = vector.extract %26[0, 0, 0] : f32 from vector<1x1x1xf32>
      %c0_23 = arith.constant 0 : index
      %c0_24 = arith.constant 0 : index
      %28 = vector.load %arg7[%c0_23, %c0_24] : memref<16x128xf32, #tpu.memory_space<vmem>>, vector<16x128xf32>
      %29 = vector.shape_cast %28 : vector<16x128xf32> to vector<1x16x128xf32>
      %cst_25 = arith.constant dense<0.000000e+00> : vector<1xf32>
      %30 = vector.multi_reduction <add>, %29, %cst_25 [1, 2] : vector<1x16x128xf32> to vector<1xf32>
      %31 = vector.shape_cast %30 : vector<1xf32> to vector<1x1x1xf32>
      %32 = vector.extract %31[0, 0, 0] : f32 from vector<1x1x1xf32>
      %33 = tpu.iota {dimensions = array<i32: 1>} : vector<8x128xi32>
      %c0_i32_26 = arith.constant 0 : i32
      %34 = vector.broadcast %c0_i32_26 : i32 to vector<8x128xi32>
      %35 = arith.cmpi eq, %33, %34 : vector<8x128xi32>
      %c1_i32 = arith.constant 1 : i32
      %36 = vector.broadcast %c1_i32 : i32 to vector<8x128xi32>
      %37 = arith.cmpi eq, %33, %36 : vector<8x128xi32>
      %c2_i32 = arith.constant 2 : i32
      %38 = vector.broadcast %c2_i32 : i32 to vector<8x128xi32>
      %39 = arith.cmpi eq, %33, %38 : vector<8x128xi32>
      %cst_27 = arith.constant 0.000000e+00 : f32
      %40 = vector.broadcast %32 : f32 to vector<8x128xf32>
      %41 = vector.broadcast %cst_27 : f32 to vector<8x128xf32>
      %42 = arith.select %39, %40, %41 : vector<8x128xi1>, vector<8x128xf32>
      %43 = vector.broadcast %27 : f32 to vector<8x128xf32>
      %44 = arith.select %37, %43, %42 : vector<8x128xi1>, vector<8x128xf32>
      %45 = vector.broadcast %22 : f32 to vector<8x128xf32>
      %46 = arith.select %35, %45, %44 : vector<8x128xi1>, vector<8x128xf32>
      %c0_28 = arith.constant 0 : index
      %c0_29 = arith.constant 0 : index
      %c0_30 = arith.constant 0 : index
      %47 = vector.load %arg4[%c0_28, %c0_29, %c0_30] : memref<1x8x128xf32, #tpu.memory_space<vmem>>, vector<1x8x128xf32>
      %48 = vector.shape_cast %47 : vector<1x8x128xf32> to vector<8x128xf32>
      %49 = vector.shape_cast %46 : vector<8x128xf32> to vector<1x8x128xf32>
      tpu.vector_store %arg4[%c0_28, %c0_29, %c0_30], %49 {strides = array<i32>} : memref<1x8x128xf32, #tpu.memory_space<vmem>>, vector<1x8x128xf32>,
    } else {
    }
    return
  }
  func.func @transform_0(%arg0: i32, %arg1: i32) -> (i32, i32) {
    %c1_i32 = arith.constant 1 : i32
    %0 = arith.muli %arg0, %c1_i32 : i32
    %1 = arith.addi %0, %arg1 : i32
    %c0_i32 = arith.constant 0 : i32
    %2 = arith.minsi %1, %c0_i32 : i32
    %c0_i32_0 = arith.constant 0 : i32
    %c0_i32_1 = arith.constant 0 : i32
    return %2, %c0_i32_0 : i32, i32
  }
  func.func @transform_1(%arg0: i32, %arg1: i32) -> (i32, i32) {
    %c1_i32 = arith.constant 1 : i32
    %0 = arith.muli %arg0, %c1_i32 : i32
    %1 = arith.addi %0, %arg1 : i32
    %c0_i32 = arith.constant 0 : i32
    %2 = arith.minsi %1, %c0_i32 : i32
    %c0_i32_0 = arith.constant 0 : i32
    %c0_i32_1 = arith.constant 0 : i32
    return %2, %c0_i32_0 : i32, i32
  }
  func.func @transform_2(%arg0: i32, %arg1: i32) -> (i32, i32, i32) {
    %c0_i32 = arith.constant 0 : i32
    %c0_i32_0 = arith.constant 0 : i32
    %c0_i32_1 = arith.constant 0 : i32
    return %arg0, %c0_i32, %c0_i32_0 : i32, i32, i32
  }
}

</mosaic_0001>

<bundles_post_ra>
// kernel: tpu_custom_call.1
= control target key start
LH: loop header
LB: loop body
LE: loop exit
PB: predicated region body
PF: predicated region fallthrough
CT: control target
= control target key end

     0   :  { %7 = vsyncpa [#allocation6], 0  ;;  %s304_s0 = inlined_call_operand.hbm [shape: f32[16,128], index: 0, kind: input, shape index: {}]   ;;  %s305_s1 = inlined_call_operand.hbm [shape: f32[16,128], index: 1, kind: input, shape index: {}]   ;;  %s306_s2 = inlined_call_operand.hbm [shape: f32[1,8,128], index: 2, kind: output, shape index: {}]  }
   0x1   :  { %8 = vsyncpa [#allocation9], 0 }
   0x2   :  { %9 = vsyncpa [#allocation7], 0  ;;  %s248_s9 = smov [#allocation5]   ;;  %s176_s13 = scalar_lea.hbm %s304_s0, 256 }
   0x3   :  { %s21_s10 = sshll.u32 %s248_s9, 4  ;;  %p177_p0 = scmp.ne.s32.totalorder %s304_s0, %s176_s13  ;;  %s22_s10 = int_to_ptr.vmem [resolvable:$true] %s21_s10 }
   0x4   :  { %p180_p1 = scmp.lt.u32.totalorder %s176_s13, %s304_s0 }
   0x6   :  { %p182_p2 = pnand %p180_p1, %p177_p0 }
   0x8   :  { %185 = shalt.err (!%p182_p2)
}
   0x9   :  { %s186_s18 = scalar_lea.vmem %s22_s10, 256  ;;  %p191_p4 = scmp.lt.s32.totalorder %s22_s10, %s22_s10 }
   0xa   :  { %p187_p3 = scmp.ne.s32.totalorder %s22_s10, %s186_s18  ;;  %p192_p5 = scmp.lt.s32.totalorder %s186_s18, %s186_s18 }
   0xc   :  { %p193_p6 = por %p192_p5, %p191_p4 }
   0xe   :  { %p194_p7 = pnand %p193_p6, %p187_p3 }
  0x10   :  { %197 = shalt.err (!%p194_p7)
}
  0x11   :  { %s249_s19 = smov 128   ;;  %s250_s20 = smov 8  }
  0x12   :  { %27 = dma.hbm_to_vmem [thread:$0]  %s304_s0, 256, %s22_s10, [#allocation6], %s249_s19, %s249_s19, %s250_s20  }
  0x13   :  { %s251_s23 = smov [#allocation8]   ;;  %s198_s27 = scalar_lea.hbm %s305_s1, 256 }
  0x14   :  { %s39_s24 = sshll.u32 %s251_s23, 4  ;;  %p199_p8 = scmp.ne.s32.totalorder %s305_s1, %s198_s27  ;;  %s40_s24 = int_to_ptr.vmem [resolvable:$true] %s39_s24 }
  0x15   :  { %p202_p9 = scmp.lt.u32.totalorder %s198_s27, %s305_s1 }
  0x17   :  { %p204_p10 = pnand %p202_p9, %p199_p8 }
  0x19   :  { %207 = shalt.err (!%p204_p10)
}
  0x1a   :  { %s208_s4 = scalar_lea.vmem %s40_s24, 256  ;;  %p213_p12 = scmp.lt.s32.totalorder %s40_s24, %s40_s24 }
  0x1b   :  { %p209_p11 = scmp.ne.s32.totalorder %s40_s24, %s208_s4  ;;  %p214_p13 = scmp.lt.s32.totalorder %s208_s4, %s208_s4 }
  0x1d   :  { %p215_p0 = por %p214_p13, %p213_p12 }
  0x1f   :  { %p216_p1 = pnand %p215_p0, %p209_p11 }
  0x21   :  { %219 = shalt.err (!%p216_p1)
}
  0x22   :  { %45 = dma.hbm_to_vmem [thread:$0]  %s305_s1, 256, %s40_s24, [#allocation9], %s249_s19, %s249_s19, %s250_s20  }
  0x23   :  { %242 = dma.done.wait [#allocation6], 256  }
  0x24   :  { %243 = vsyncadd [#allocation6], 4294967040 }
  0x25   :  { %244 = dma.done.wait [#allocation9], 256  }
  0x26   :  { %245 = vsyncadd [#allocation9], 4294967040  ;;  %v72_v0 = vld [vmem:[#allocation8] sm:$0xff]  ;;  %v73_v1 = vld [vmem:[#allocation8 + $0x8] sm:$0xff]  ;;  %v133_v30 = vlaneseq  ;;  %s252_s8 = smov [#allocation10]  }
  0x27   :  { %v70_v2 = vld [vmem:[#allocation5] sm:$0xff]  ;;  %v123_v3 = vadd.f32 %v73_v1, %v72_v0  ;;  %v71_v4 = vld [vmem:[#allocation5 + $0x8] sm:$0xff]  ;;  %s151_s9 = sshll.u32 %s252_s8, 4  ;;  %s152_s9 = int_to_ptr.vmem [resolvable:$true] %s151_s9 }
  0x28   :  { %v76_v5 = vmul.f32 %v72_v0, %v70_v2  ;;  %v77_v6 = vmul.f32 %v73_v1, %v71_v4  ;;  %v111_v8 = vadd.f32 %v71_v4, %v70_v2  ;;  %v134_v31 = vand.u32 127, %v133_v30  ;;  %s220_s10 = scalar_lea.vmem %s152_s9, 128  ;;  %p225_p3 = scmp.lt.s32.totalorder %s152_s9, %s152_s9 }
  0x29   :  { %124 = vadd.xlane.f32.xlu1 %v123_v3  ;;  %p221_p2 = scmp.ne.s32.totalorder %s152_s9, %s220_s10  ;;  %p226_p4 = scmp.lt.s32.totalorder %s220_s10, %s220_s10 }
  0x2a   :  { %v99_v7 = vadd.f32 %v77_v6, %v76_v5  ;;  %vm137_vm0 = vcmp.eq.s32.totalorder %v134_v31, 2  ;;  %vm136_vm1 = vcmp.eq.s32.totalorder %v134_v31, 1  ;;  %vm135_vm2 = vcmp.eq.s32.totalorder %v134_v31, 0 }
  0x2b   :  { %p227_p5 = por %p226_p4, %p225_p3 }
  0x2c   :  { %100 = vadd.xlane.f32.xlu0 %v99_v7 }
  0x2d   :  { %p228_p6 = pnand %p227_p5, %p221_p2 }
  0x30   :  { %112 = vadd.xlane.f32.xlu0 %v111_v8 }
  0xb6   :  { %v125_v9 = vpop.xlane.xlu1 %124 }
  0xb7   :  { %v126_v10 = vrot.slane %v125_v9, 4 }
  0xb9   :  { %v127_v11 = vadd.f32 %v126_v10, %v125_v9  ;;  %v101_v12 = vpop.xlane.xlu0 %100 }
  0xba   :  { %v102_v13 = vrot.slane %v101_v12, 4 }
  0xbb   :  { %v128_v15 = vrot.slane %v127_v11, 2 }
  0xbc   :  { %v103_v14 = vadd.f32 %v102_v13, %v101_v12 }
  0xbd   :  { %v113_v16 = vpop.xlane.xlu0 %112  ;;  %v129_v21 = vadd.f32 %v128_v15, %v127_v11 }
  0xbe   :  { %v104_v17 = vrot.slane %v103_v14, 2  ;;  %v114_v18 = vrot.slane %v113_v16, 4 }
  0xbf   :  { %v130_v26 = vrot.slane %v129_v21, 1 }
  0xc0   :  { %v115_v19 = vadd.f32 %v114_v18, %v113_v16  ;;  %v105_v20 = vadd.f32 %v104_v17, %v103_v14 }
  0xc1   :  { %v131_v29 = vadd.f32 %v130_v26, %v129_v21 }
  0xc2   :  { %v116_v22 = vrot.slane %v115_v19, 2  ;;  %v106_v23 = vrot.slane %v105_v20, 1 }
  0xc4   :  { %v117_v24 = vadd.f32 %v116_v22, %v115_v19  ;;  %v107_v25 = vadd.f32 %v106_v23, %v105_v20 }
  0xc6   :  { %165 = vpush %v107_v25  ;;  %v118_v27 = vrot.slane %v117_v24, 1 }
  0xc8   :  { %v119_v28 = vadd.f32 %v118_v27, %v117_v24 }
  0xca   :  { %167 = vpush %v119_v28 }
  0xcb   :  { %169 = vpush %v131_v29 }
  0xf7   :  { %s166_s1 = spop %165 }
  0xf8   :  { %v142_v35 = vstv %s166_s1 }
  0xfb   :  { %s168_s6 = spop %167 }
  0xfc   :  { %v140_v32 = vstv %s168_s6  ;;  %s170_s7 = spop %169 }
  0xfd   :  { %v138_v33 = vstv %s170_s7 }
  0xfe   :  { %v139_v34 = vsel %vm137_vm0, %v138_v33, 0.0 }
  0xff   :  { %v141_v36 = vsel %vm136_vm1, %v140_v32, %v139_v34 }
 0x100   :  { %v143_v37 = vsel %vm135_vm2, %v142_v35, %v141_v36 }
 0x101   :  { %144 = vst [vmem:[#allocation10] sm:$0xff] %v143_v37 }
 0x102   :  { %231 = shalt.err (!%p228_p6)
}
 0x103   :  { %s232_s13 = scalar_lea.hbm %s306_s2, 128 }
 0x104   :  { %p233_p7 = scmp.ne.s32.totalorder %s306_s2, %s232_s13  ;;  %p236_p8 = scmp.lt.u32.totalorder %s232_s13, %s306_s2 }
 0x106   :  { %p238_p9 = pnand %p236_p8, %p233_p7 }
 0x108   :  { %241 = shalt.err (!%p238_p9)
}
 0x109   :  { %154 = dma.vmem_to_hbm [thread:$0]  %s152_s9, 128, %s306_s2, [#allocation7]  }
 0x10a   :  { %246 = dma.done.wait [#allocation7], 128  }
 0x10b   :  { %247 = vsyncadd [#allocation7], 4294967168 }
 0x10c   :  { %158 = vsyncpa [#allocation6], 1 }
 0x10d   :  { %159 = vsyncpa [#allocation9], 1 }
 0x10e   :  { %160 = vsyncpa [#allocation7], 1 }

</bundles_post_ra>
